<compile_context>
chip_gen: v7x
topology: tpu7x:2x2x1
jax: 0.10.0
libtpu: 0.0.40
codegen_flags: <defaults>
</compile_context>

<pallas_src>
import jax
import jax.numpy as jnp
from jax.experimental import pallas as pl
from jax.experimental.pallas import tpu as pltpu


def _sigmoid(x):
    # single-EUP-op logistic: sigmoid(x) == 0.5 * (tanh(x/2) + 1)
    return 0.5 * (jnp.tanh(0.5 * x) + 1.0)


# ---------------------------------------------------------------------------
# Kernel A: batched input-side projection (pre_fc + ReLU + @W_ih + fused biases)
# ---------------------------------------------------------------------------
def _proj_kernel(x_ref, wpre_ref, bpre_ref, wih_ref, bg_ref, gx_ref):
    x = x_ref[...]                                                     # (B*S, D_in)
    xp = jnp.dot(x, wpre_ref[...], preferred_element_type=jnp.float32) + bpre_ref[...]
    xp = jnp.maximum(xp, 0.0)
    gx = jnp.dot(xp, wih_ref[...], preferred_element_type=jnp.float32) + bg_ref[...]
    gx_ref[...] = gx.astype(gx_ref.dtype)


# ---------------------------------------------------------------------------
# Kernel B: the LSTM recurrence over chunks of T timesteps.
# ---------------------------------------------------------------------------
def _lstm_chunk_kernel(gx_ref, h0_ref, c0_ref, whh_ref,
                       hall_ref, hN_ref, cN_ref,
                       h_sc, c_sc):
    chunk = pl.program_id(0)

    @pl.when(chunk == 0)
    def _():
        h_sc[...] = h0_ref[...]
        c_sc[...] = c0_ref[...]

    H = h_sc.shape[1]
    T = gx_ref.shape[1]

    h = h_sc[...]
    c = c_sc[...]
    whh = whh_ref[...]
    gx_all = gx_ref[...]                     # (B, T, 4H) loaded once per chunk

    hs = []
    for tt in range(T):                      # static unroll over the chunk
        gates = gx_all[:, tt, :] + jnp.dot(h, whh, preferred_element_type=jnp.float32)
        i_g = _sigmoid(gates[:, 0 * H:1 * H])
        f_g = _sigmoid(gates[:, 1 * H:2 * H])
        g_g = jnp.tanh(gates[:, 2 * H:3 * H])
        o_g = _sigmoid(gates[:, 3 * H:4 * H])
        c = f_g * c + i_g * g_g
        h = o_g * jnp.tanh(c)
        hs.append(h)

    # One dense (B, T, H) store per chunk instead of one tiny store per timestep.
    hall_ref[...] = jnp.stack(hs, axis=1).astype(hall_ref.dtype)

    # Carry state to the next chunk.  hN/cN have constant block indices, so the block
    # stays resident across the (arbitrary) time axis and only the final values land in HBM.
    h_sc[...] = h
    c_sc[...] = c
    hN_ref[...] = h.astype(hN_ref.dtype)
    cN_ref[...] = c.astype(cN_ref.dtype)


# ---------------------------------------------------------------------------
# Kernel C: batched fc_out (after eval-mode dropout = identity)
# ---------------------------------------------------------------------------
def _fcout_kernel(h_ref, wout_ref, bout_ref, o_ref):
    o = jnp.dot(h_ref[...], wout_ref[...], preferred_element_type=jnp.float32) + bout_ref[...]
    o_ref[...] = o.astype(o_ref.dtype)


def _full_spec(shape):
    n = len(shape)
    return pl.BlockSpec(shape, lambda i, _n=n: (0,) * _n)


def decoder_forward(x, hidden, cell, params, *, chunk=16):
    """x: (B, S, D_in); hidden/cell: (1, B, H). Returns (out (B, S, D_out), hidden, cell)."""
    B, S, D_in = x.shape
    H = hidden.shape[-1]
    G = 4 * H
    D_out = params["w_out"].shape[1]
    BS = B * S

    h0 = hidden[0].astype(jnp.float32)
    c0 = cell[0].astype(jnp.float32)

    # Fold the two LSTM biases into a single vector added in the hoisted projection.
    b_gates = params["b_ih"] + params["b_hh"]

    # --- Kernel A: hoisted input-side projections for all timesteps -----------------
    x2d = x.reshape(BS, D_in)
    gx2d = pl.pallas_call(
        _proj_kernel,
        out_shape=jax.ShapeDtypeStruct((BS, G), jnp.float32),
        grid=(1,),
        in_specs=[_full_spec((BS, D_in)),
                  _full_spec((D_in, D_in)),
                  _full_spec((1, D_in)),
                  _full_spec((D_in, G)),
                  _full_spec((1, G))],
        out_specs=_full_spec((BS, G)),
    )(x2d, params["w_pre"], params["b_pre"], params["w_ih"], b_gates)
    gx = gx2d.reshape(B, S, G)

    # --- Kernel B: recurrence, chunked over timesteps --------------------------------
    T = min(chunk, S)
    while S % T != 0:          # largest chunk size <= `chunk` that divides S
        T -= 1

    hall, hN, cN = pl.pallas_call(
        _lstm_chunk_kernel,
        out_shape=(jax.ShapeDtypeStruct((B, S, H), jnp.float32),
                   jax.ShapeDtypeStruct((B, H), jnp.float32),
                   jax.ShapeDtypeStruct((B, H), jnp.float32)),
        grid=(S // T,),
        in_specs=[pl.BlockSpec((B, T, G), lambda c: (0, c, 0)),   # gate pre-activations
                  pl.BlockSpec((B, H), lambda c: (0, 0)),          # h0
                  pl.BlockSpec((B, H), lambda c: (0, 0)),          # c0
                  pl.BlockSpec((H, G), lambda c: (0, 0))],         # W_hh
        out_specs=[pl.BlockSpec((B, T, H), lambda c: (0, c, 0)),   # all hidden states
                   pl.BlockSpec((B, H), lambda c: (0, 0)),         # final h
                   pl.BlockSpec((B, H), lambda c: (0, 0))],        # final c
        scratch_shapes=[pltpu.VMEM((B, H), jnp.float32),           # h carry
                        pltpu.VMEM((B, H), jnp.float32)],          # c carry
        compiler_params=pltpu.CompilerParams(
            dimension_semantics=("arbitrary",),                    # time is sequential
        ),
    )(gx, h0, c0, params["w_hh"])

    # --- Dropout (eval mode => identity) + Kernel C: batched fc_out -------------------
    # TODO(synk): training-mode dropout (random mask + 1/(1-p) scaling) not implemented;
    # eval-mode (identity) semantics are used here.
    out2d = pl.pallas_call(
        _fcout_kernel,
        out_shape=jax.ShapeDtypeStruct((BS, D_out), jnp.float32),
        grid=(1,),
        in_specs=[_full_spec((BS, H)),
                  _full_spec((H, D_out)),
                  _full_spec((1, D_out))],
        out_specs=_full_spec((BS, D_out)),
    )(hall.reshape(BS, H), params["w_out"], params["b_out"])
    out = out2d.reshape(B, S, D_out)

    return out, hN[None], cN[None]


def decoder_reference(x, hidden, cell, params):
    """Pure-JAX reference with identical math (eval-mode dropout)."""
    B, S, D_in = x.shape
    H = hidden.shape[-1]
    h = hidden[0]
    c = cell[0]
    xp = jnp.maximum(x @ params["w_pre"] + params["b_pre"][0], 0.0)
    outs = []
    for t in range(S):
        gates = xp[:, t, :] @ params["w_ih"] + params["b_ih"][0] \
              + h @ params["w_hh"] + params["b_hh"][0]
        i_g = _sigmoid(gates[:, 0 * H:1 * H])
        f_g = _sigmoid(gates[:, 1 * H:2 * H])
        g_g = jnp.tanh(gates[:, 2 * H:3 * H])
        o_g = _sigmoid(gates[:, 3 * H:4 * H])
        c = f_g * c + i_g * g_g
        h = o_g * jnp.tanh(c)
        outs.append(h @ params["w_out"] + params["b_out"][0])
    out = jnp.stack(outs, axis=1)
    return out, h[None], c[None]


def make_params(key, input_dim, output_dim, hidden_dim):
    ks = jax.random.split(key, 10)
    scale = 0.1
    return {
        "w_pre": scale * jax.random.normal(ks[0], (input_dim, input_dim), jnp.float32),
        "b_pre": scale * jax.random.normal(ks[1], (1, input_dim), jnp.float32),
        "w_ih":  scale * jax.random.normal(ks[2], (input_dim, 4 * hidden_dim), jnp.float32),
        "b_ih":  scale * jax.random.normal(ks[3], (1, 4 * hidden_dim), jnp.float32),
        "w_hh":  scale * jax.random.normal(ks[4], (hidden_dim, 4 * hidden_dim), jnp.float32),
        "b_hh":  scale * jax.random.normal(ks[5], (1, 4 * hidden_dim), jnp.float32),
        "w_out": scale * jax.random.normal(ks[6], (hidden_dim, output_dim), jnp.float32),
        "b_out": scale * jax.random.normal(ks[7], (1, output_dim), jnp.float32),
    }


if __name__ == "__main__":
    B, S = 2, 8
    input_dim, hidden_dim, output_dim = 16, 32, 4

    key = jax.random.PRNGKey(0)
    k_x, k_h, k_c, k_p = jax.random.split(key, 4)

    x = jax.random.normal(k_x, (B, S, input_dim), jnp.float32)
    hidden = jax.random.normal(k_h, (1, B, hidden_dim), jnp.float32)
    cell = jax.random.normal(k_c, (1, B, hidden_dim), jnp.float32)
    params = make_params(k_p, input_dim, output_dim, hidden_dim)

    out, hN, cN = decoder_forward(x, hidden, cell, params)
    jax.block_until_ready((out, hN, cN))

    out_ref, hN_ref, cN_ref = decoder_reference(x, hidden, cell, params)
    assert jnp.allclose(out, out_ref, atol=2e-5, rtol=1e-4), "output mismatch"
    assert jnp.allclose(hN, hN_ref, atol=2e-5, rtol=1e-4), "hidden mismatch"
    assert jnp.allclose(cN, cN_ref, atol=2e-5, rtol=1e-4), "cell mismatch"

    print("KERNEL_OK")
</pallas_src>

<mosaic_0001>
module attributes {stable_mosaic.version = 11 : i64} {
  func.func @_proj_kernel(%arg0: i32, %arg1: memref<16x16xf32, #tpu.memory_space<vmem>>, %arg2: memref<16x16xf32, #tpu.memory_space<vmem>>, %arg3: memref<1x16xf32, #tpu.memory_space<vmem>>, %arg4: memref<16x128xf32, #tpu.memory_space<vmem>>, %arg5: memref<1x128xf32, #tpu.memory_space<vmem>>, %arg6: memref<16x128xf32, #tpu.memory_space<vmem>>) attributes {dimension_semantics = [#tpu.dimension_semantics<arbitrary>], iteration_bounds = array<i64: 1>, scalar_prefetch = 0 : i64, scratch_operands = 0 : i64, tpu.core_type = #tpu.core_type<tc>, window_params = [{pipeline_mode = #tpu.pipeline_mode<synchronous>, transform_indices = @transform_0, window_bounds = array<i64: 16, 16>}, {pipeline_mode = #tpu.pipeline_mode<synchronous>, transform_indices = @transform_1, window_bounds = array<i64: 16, 16>}, {pipeline_mode = #tpu.pipeline_mode<synchronous>, transform_indices = @transform_2, window_bounds = array<i64: 1, 16>}, {pipeline_mode = #tpu.pipeline_mode<synchronous>, transform_indices = @transform_3, window_bounds = array<i64: 16, 128>}, {pipeline_mode = #tpu.pipeline_mode<synchronous>, transform_indices = @transform_4, window_bounds = array<i64: 1, 128>}, {pipeline_mode = #tpu.pipeline_mode<synchronous>, transform_indices = @transform_5, window_bounds = array<i64: 16, 128>}]} {
    %c0 = arith.constant 0 : index
    %c0_0 = arith.constant 0 : index
    %0 = vector.load %arg1[%c0, %c0_0] : memref<16x16xf32, #tpu.memory_space<vmem>>, vector<16x16xf32>
    %c0_1 = arith.constant 0 : index
    %c0_2 = arith.constant 0 : index
    %1 = vector.load %arg2[%c0_1, %c0_2] : memref<16x16xf32, #tpu.memory_space<vmem>>, vector<16x16xf32>
    %cst = arith.constant dense<0.000000e+00> : vector<16x16xf32>
    %2 = tpu.matmul %0, %1, %cst {dimension_numbers = #tpu.dot_dimension_numbers<[1], [0], [0], [1], [0, 0, 1, 1], [], []>} : vector<16x16xf32>, vector<16x16xf32>, vector<16x16xf32> -> vector<16x16xf32>
    %c0_3 = arith.constant 0 : index
    %c0_4 = arith.constant 0 : index
    %3 = vector.load %arg3[%c0_3, %c0_4] : memref<1x16xf32, #tpu.memory_space<vmem>>, vector<1x16xf32>
    %4 = vector.broadcast %3 : vector<1x16xf32> to vector<16x16xf32>
    %5 = arith.addf %2, %4 : vector<16x16xf32>
    %cst_5 = arith.constant 0.000000e+00 : f32
    %6 = vector.broadcast %cst_5 : f32 to vector<16x16xf32>
    %7 = arith.maximumf %5, %6 : vector<16x16xf32>
    %c0_6 = arith.constant 0 : index
    %c0_7 = arith.constant 0 : index
    %8 = vector.load %arg4[%c0_6, %c0_7] : memref<16x128xf32, #tpu.memory_space<vmem>>, vector<16x128xf32>
    %cst_8 = arith.constant dense<0.000000e+00> : vector<16x128xf32>
    %9 = tpu.matmul %7, %8, %cst_8 {dimension_numbers = #tpu.dot_dimension_numbers<[1], [0], [0], [1], [0, 0, 1, 1], [], []>} : vector<16x16xf32>, vector<16x128xf32>, vector<16x128xf32> -> vector<16x128xf32>
    %c0_9 = arith.constant 0 : index
    %c0_10 = arith.constant 0 : index
    %10 = vector.load %arg5[%c0_9, %c0_10] : memref<1x128xf32, #tpu.memory_space<vmem>>, vector<1x128xf32>
    %11 = vector.broadcast %10 : vector<1x128xf32> to vector<16x128xf32>
    %12 = arith.addf %9, %11 : vector<16x128xf32>
    %c0_11 = arith.constant 0 : index
    %c0_12 = arith.constant 0 : index
    %13 = vector.load %arg6[%c0_11, %c0_12] : memref<16x128xf32, #tpu.memory_space<vmem>>, vector<16x128xf32>
    tpu.vector_store %arg6[%c0_11, %c0_12], %12 {strides = array<i32>} : memref<16x128xf32, #tpu.memory_space<vmem>>, vector<16x128xf32>,
    return
  }
  func.func @transform_0(%arg0: i32) -> (i32, i32) {
    %c0_i32 = arith.constant 0 : i32
    %c0_i32_0 = arith.constant 0 : i32
    %c0_i32_1 = arith.constant 0 : i32
    return %c0_i32, %c0_i32_0 : i32, i32
  }
  func.func @transform_1(%arg0: i32) -> (i32, i32) {
    %c0_i32 = arith.constant 0 : i32
    %c0_i32_0 = arith.constant 0 : i32
    %c0_i32_1 = arith.constant 0 : i32
    return %c0_i32, %c0_i32_0 : i32, i32
  }
  func.func @transform_2(%arg0: i32) -> (i32, i32) {
    %c0_i32 = arith.constant 0 : i32
    %c0_i32_0 = arith.constant 0 : i32
    %c0_i32_1 = arith.constant 0 : i32
    return %c0_i32, %c0_i32_0 : i32, i32
  }
  func.func @transform_3(%arg0: i32) -> (i32, i32) {
    %c0_i32 = arith.constant 0 : i32
    %c0_i32_0 = arith.constant 0 : i32
    %c0_i32_1 = arith.constant 0 : i32
    return %c0_i32, %c0_i32_0 : i32, i32
  }
  func.func @transform_4(%arg0: i32) -> (i32, i32) {
    %c0_i32 = arith.constant 0 : i32
    %c0_i32_0 = arith.constant 0 : i32
    %c0_i32_1 = arith.constant 0 : i32
    return %c0_i32, %c0_i32_0 : i32, i32
  }
  func.func @transform_5(%arg0: i32) -> (i32, i32) {
    %c0_i32 = arith.constant 0 : i32
    %c0_i32_0 = arith.constant 0 : i32
    %c0_i32_1 = arith.constant 0 : i32
    return %c0_i32, %c0_i32_0 : i32, i32
  }
}

</mosaic_0001>

<bundles_post_ra>
// kernel: tpu_custom_call.1
= control target key start
LH: loop header
LB: loop body
LE: loop exit
PB: predicated region body
PF: predicated region fallthrough
CT: control target
= control target key end

     0   :  { %10 = vsyncpa [#allocation3], 0  ;;  %s516_s0 = inlined_call_operand.hbm [shape: f32[16,16], index: 0, kind: input, shape index: {}]   ;;  %s517_s1 = inlined_call_operand.hbm [shape: f32[16,16], index: 1, kind: input, shape index: {}]   ;;  %s518_s2 = inlined_call_operand.vmem [shape: f32[1,16], index: 2, kind: input, shape index: {}]   ;;  %s519_s3 = inlined_call_operand.hbm [shape: f32[16,128], index: 3, kind: input, shape index: {}]   ;;  %s520_s4 = inlined_call_operand.vmem [shape: f32[1,128], index: 4, kind: input, shape index: {}]   ;;  %s521_s5 = inlined_call_operand.hbm [shape: f32[16,128], index: 5, kind: output, shape index: {}]  }
   0x1   :  { %11 = vsyncpa [#allocation6], 0 }
   0x2   :  { %12 = vsyncpa [#allocation4], 0  ;;  %s403_s18 = smov [#allocation5]   ;;  %s404_s20 = smov [#allocation2]  }
   0x3   :  { %s30_s19 = sshll.u32 %s403_s18, 4  ;;  %s18_s21 = sshll.u32 %s404_s20, 4  ;;  %s31_s19 = int_to_ptr.vmem [resolvable:$true] %s30_s19  ;;  %s439_s21 = int_to_ptr.vmem [resolvable:$true] %s18_s21 }
   0x4   :  { %s309_s24 = scalar_lea.hbm %s517_s1, 256 }
   0x5   :  { %p310_p0 = scmp.ne.s32.totalorder %s517_s1, %s309_s24  ;;  %p313_p1 = scmp.lt.u32.totalorder %s309_s24, %s517_s1 }
   0x7   :  { %p315_p2 = pnand %p313_p1, %p310_p0 }
   0x9   :  { %318 = shalt.err (!%p315_p2)
}
   0xa   :  { %s319_s29 = scalar_lea.vmem %s31_s19, 256  ;;  %p324_p4 = scmp.lt.s32.totalorder %s31_s19, %s31_s19 }
   0xb   :  { %p320_p3 = scmp.ne.s32.totalorder %s31_s19, %s319_s29  ;;  %p325_p5 = scmp.lt.s32.totalorder %s319_s29, %s319_s29 }
   0xd   :  { %p326_p6 = por %p325_p5, %p324_p4 }
   0xf   :  { %p327_p7 = pnand %p326_p6, %p320_p3 }
  0x11   :  { %330 = shalt.err (!%p327_p7)
}
  0x12   :  { %s405_s30 = smov 128   ;;  %s406_s6 = smov 8  }
  0x13   :  { %36 = dma.hbm_to_vmem [thread:$0]  %s517_s1, 256, %s31_s19, [#allocation6], %s405_s30, %s405_s30, %s406_s6  }
  0x14   :  { %s331_s11 = scalar_lea.hbm %s516_s0, 256 }
  0x15   :  { %p332_p8 = scmp.ne.s32.totalorder %s516_s0, %s331_s11  ;;  %p335_p9 = scmp.lt.u32.totalorder %s331_s11, %s516_s0 }
  0x17   :  { %p337_p10 = pnand %p335_p9, %p332_p8 }
  0x19   :  { %340 = shalt.err (!%p337_p10)
}
  0x1a   :  { %s341_s16 = scalar_lea.vmem %s439_s21, 256  ;;  %p346_p12 = scmp.lt.s32.totalorder %s439_s21, %s439_s21 }
  0x1b   :  { %p342_p11 = scmp.ne.s32.totalorder %s439_s21, %s341_s16  ;;  %p347_p13 = scmp.lt.s32.totalorder %s341_s16, %s341_s16 }
  0x1d   :  { %p348_p0 = por %p347_p13, %p346_p12 }
  0x1f   :  { %p349_p1 = pnand %p348_p0, %p342_p11 }
  0x21   :  { %352 = shalt.err (!%p349_p1)
}
  0x22   :  { %24 = dma.hbm_to_vmem [thread:$0]  %s516_s0, 256, %s439_s21, [#allocation3], %s405_s30, %s405_s30, %s406_s6  }
  0x23   :  { %s407_s18 = smov [#allocation7]   ;;  %s353_s23 = scalar_lea.hbm %s519_s3, 256 }
  0x24   :  { %s44_s19 = sshll.u32 %s407_s18, 4  ;;  %p354_p2 = scmp.ne.s32.totalorder %s519_s3, %s353_s23  ;;  %s45_s19 = int_to_ptr.vmem [resolvable:$true] %s44_s19 }
  0x25   :  { %p357_p3 = scmp.lt.u32.totalorder %s353_s23, %s519_s3 }
  0x27   :  { %p359_p4 = pnand %p357_p3, %p354_p2 }
  0x29   :  { %362 = shalt.err (!%p359_p4)
}
  0x2a   :  { %s363_s28 = scalar_lea.vmem %s45_s19, 256  ;;  %p368_p6 = scmp.lt.s32.totalorder %s45_s19, %s45_s19 }
  0x2b   :  { %p364_p5 = scmp.ne.s32.totalorder %s45_s19, %s363_s28  ;;  %p369_p7 = scmp.lt.s32.totalorder %s363_s28, %s363_s28 }
  0x2d   :  { %p370_p8 = por %p369_p7, %p368_p6 }
  0x2f   :  { %p371_p9 = pnand %p370_p8, %p364_p5 }
  0x31   :  { %374 = shalt.err (!%p371_p9)
}
  0x32   :  { %50 = dma.hbm_to_vmem [thread:$0]  %s519_s3, 256, %s45_s19, [#allocation6], %s405_s30, %s405_s30, %s406_s6  }
  0x33   :  { %397 = dma.done.wait [#allocation3], 256  }
  0x34   :  { %398 = vsyncadd [#allocation3], 4294967040 }
  0x35   :  { %399 = dma.done.wait [#allocation6], 512  }
  0x36   :  { %400 = vsyncadd [#allocation6], 4294966784  ;;  %vm73_vm0 = vcmask 130048   ;;  %v64_v0 = vld [vmem:[#allocation5] sm:$0xff]  ;;  %v65_v1 = vld [vmem:[#allocation5 + $0x8] sm:$0xff]  ;;  %s408_s9 = smov [#allocation8]  }
  0x37   :  { %v62_v2 = vld [vmem:[#allocation2] sm:$0xff]  ;;  %v295_v3 = vpack.c.bf16 %v65_v1, %v64_v0  ;;  %v63_v4 = vld [vmem:[#allocation2 + $0x8] sm:$0xff]  ;;  %s254_s10 = sshll.u32 %s408_s9, 4  ;;  %s255_s10 = int_to_ptr.vmem [resolvable:$true] %s254_s10 }
  0x38   :  { %285 = vmatprep.mubr.msk.f32.mxu0 %vm73_vm0, %v62_v2  ;;  %v157_v5 = vld [vmem:[#allocation7] sm:$0xff]  ;;  %v158_v6 = vld [vmem:[#allocation7 + $0x8] sm:$0xff]  ;;  %p380_p11 = scmp.lt.s32.totalorder %s255_s10, %s255_s10 }
  0x39   :  { %296 = vmatprep.subr.bf16.mxu0 %v295_v3  ;;  %v299_v7 = vpack.c.bf16 %v158_v6, %v157_v5  ;;  %v267_v8 = vld [vmem:[%s518_s2] ss:$0 sm:$0xff]  ;;  %s375_s2 = scalar_lea.vmem %s255_s10, 256 }
  0x3a   :  { %298 = vmatpush3.bf16.msra.mxu0 %v295_v3  ;;  %v270_v15 = vld [vmem:[%s520_s4] ss:$0 sm:$0xff]  ;;  %p376_p10 = scmp.ne.s32.totalorder %s255_s10, %s375_s2  ;;  %p381_p12 = scmp.lt.s32.totalorder %s375_s2, %s375_s2 }
  0x3b   :  { %300 = vmatprep.subr.bf16.mxu1 %v299_v7 }
  0x3c   :  { %302 = vmatpush3.bf16.msra.mxu1 %v299_v7  ;;  %p382_p13 = por %p381_p12, %p380_p11 }
  0x3d   :  { %286 = vmatmul.mubr.msk.f32.vlgmr.msra.gmra.mrb[0].mxu0 %vm73_vm0, %v63_v4 }
  0x3e   :  { %p383_p0 = pnand %p382_p13, %p376_p10 }
 0x110   :  { %v287_v9 = vpop.f32.mrb[0].mxu0 }
 0x111   :  { %v152_v10 = vadd.f32 %v287_v9, %v267_v8  ;;  %v146_v11 = vpop.f32.mrb[1].mxu0 }
 0x112   :  { %v147_v12 = vadd.f32 %v267_v8, %v146_v11 }
 0x113   :  { %v156_v14 = vmax.f32 %v152_v10, 0.0 }
 0x114   :  { %v155_v13 = vmax.f32 %v147_v12, 0.0 }
 0x116   :  { %292 = vmatprep.mubr.msk.f32.mxu1 %vm73_vm0, %v155_v13 }
 0x117   :  { %293 = vmatmul.mubr.msk.f32.vlgmr.msra.gmra.mrb[0].mxu1 %vm73_vm0, %v156_v14 }
 0x1ea   :  { %v294_v16 = vpop.f32.mrb[0].mxu1 }
 0x1eb   :  { %v244_v17 = vadd.f32 %v294_v16, %v270_v15  ;;  %v238_v18 = vpop.f32.mrb[1].mxu1 }
 0x1ec   :  { %v239_v19 = vadd.f32 %v270_v15, %v238_v18 }
 0x1ed   :  { %248 = vst [vmem:[#allocation8 + $0x8] sm:$0xff] %v244_v17 }
 0x1ee   :  { %247 = vst [vmem:[#allocation8] sm:$0xff] %v239_v19 }
 0x1ef   :  { %386 = shalt.err (!%p383_p0)
}
 0x1f0   :  { %s387_s4 = scalar_lea.hbm %s521_s5, 256 }
 0x1f1   :  { %p388_p1 = scmp.ne.s32.totalorder %s521_s5, %s387_s4  ;;  %p391_p2 = scmp.lt.u32.totalorder %s387_s4, %s521_s5 }
 0x1f3   :  { %p393_p3 = pnand %p391_p2, %p388_p1 }
 0x1f5   :  { %396 = shalt.err (!%p393_p3)
}
 0x1f6   :  { %260 = dma.vmem_to_hbm [thread:$0]  %s255_s10, 256, %s521_s5, [#allocation4], %s405_s30, %s405_s30, %s406_s6  }
 0x1f7   :  { %401 = dma.done.wait [#allocation4], 256  }
 0x1f8   :  { %402 = vsyncadd [#allocation4], 4294967040 }
 0x1f9   :  { %264 = vsyncpa [#allocation3], 1 }
 0x1fa   :  { %265 = vsyncpa [#allocation6], 1 }
 0x1fb   :  { %266 = vsyncpa [#allocation4], 1 }

</bundles_post_ra>
